<compile_context>
chip_gen: v7x
topology: tpu7x:2x2x1
jax: 0.10.0
libtpu: 0.0.40
codegen_flags: <defaults>
</compile_context>

<pallas_src>
import jax
import jax.numpy as jnp
from jax.experimental import pallas as pl
from jax.experimental.pallas import tpu as pltpu


_LANE_WIDTHS = (8192, 4096, 2048, 1024, 512, 256, 128)
_PHASE1_TILE_BYTES = 8 << 20     # reduction tiles (input only is double-buffered)
_PHASE2_TILE_BYTES = 4 << 20     # subtract tiles (input + output double-buffered)
_PIPELINED_VMEM_LIMIT = 48 << 20  # covers 2x8 MiB (ph.1) / 4x4 MiB (ph.2) + f32 temps


def _vmem_capacity_bytes():
    """Physical VMEM of the local TPU generation (conservative fallback)."""
    try:
        info = pltpu.get_tpu_info()
        cap = getattr(info, "vmem_capacity_bytes", None)
        if cap:
            return int(cap)
    except Exception:
        pass
    return 64 << 20  # v7x per-TensorCore VMEM; safe lower bound


def _single_block_view(n):
    """Lane-dense 2D view (rows, cols) with cols % 128 == 0; prefer rows % 8 == 0."""
    fallback = None
    for cols in _LANE_WIDTHS:
        if n % cols:
            continue
        rows = n // cols
        if rows % 8 == 0:
            return rows, cols
        if fallback is None:
            fallback = (rows, cols)
    return fallback


def _largest_tile_rows(rows, cols, itemsize, budget_bytes):
    """Largest divisor of `rows` that is a multiple of 8 and fits `budget_bytes`."""
    cap = budget_bytes // (cols * itemsize)
    if cap < 8:
        return None
    best = None
    i = 1
    while i * i <= rows:
        if rows % i == 0:
            for d in (i, rows // i):
                if d % 8 == 0 and d <= cap and (best is None or d > best):
                    best = d
        i += 1
    return best


def _tiled_view(n, itemsize):
    """(rows, cols, tile_rows_phase1, tile_rows_phase2) maximizing phase-2 tile bytes."""
    best = None
    for cols in _LANE_WIDTHS:
        if n % cols:
            continue
        rows = n // cols
        tr2 = _largest_tile_rows(rows, cols, itemsize, _PHASE2_TILE_BYTES)
        if tr2 is None:
            continue
        tr1 = _largest_tile_rows(rows, cols, itemsize, _PHASE1_TILE_BYTES)
        tile_bytes = tr2 * cols * itemsize
        if best is None or tile_bytes > best[0]:
            best = (tile_bytes, rows, cols, tr1, tr2)
    if best is None:
        return None
    _, rows, cols, tr1, tr2 = best
    return rows, cols, tr1, tr2


# ---------------------------------------------------------------------------
# Single grid-less block: 2N bytes of HBM traffic.
# ---------------------------------------------------------------------------
def _single_block(x2d, inv_n, phys_vmem):
    def kernel(x_ref, o_ref):
        x = x_ref[...]
        total = jnp.sum(x, dtype=jnp.float32)               # accumulate in f32
        mean = (total * jnp.float32(inv_n)).astype(x_ref.dtype)
        o_ref[...] = x - mean

    nbytes = int(x2d.size) * jnp.dtype(x2d.dtype).itemsize
    vlim = int(max(32 << 20, min(phys_vmem - (16 << 20), 6 * nbytes + (8 << 20))))
    return pl.pallas_call(
        kernel,
        out_shape=jax.ShapeDtypeStruct(x2d.shape, x2d.dtype),
        # Block == full array => exempt from the (8,128) divisibility rule.
        in_specs=[pl.BlockSpec(x2d.shape, lambda: (0, 0))],
        out_specs=pl.BlockSpec(x2d.shape, lambda: (0, 0)),
        compiler_params=pltpu.CompilerParams(vmem_limit_bytes=vlim),
    )(x2d)


# ---------------------------------------------------------------------------
# Two-phase tiled path: 3N bytes of HBM traffic, pipelined lane-dense tiles.
# ---------------------------------------------------------------------------
def _two_phase(x2d, inv_n, tr1, tr2, phys_vmem, donate):
    rows, cols = x2d.shape
    vlim = int(max(32 << 20, min(phys_vmem - (16 << 20), _PIPELINED_VMEM_LIMIT)))

    # ---- phase 1: global sum; leading "parallel" axis lets v7x's 2 TCs both pull HBM ----
    t1 = rows // tr1
    split = 2 if (t1 >= 2 and t1 % 2 == 0) else 1
    tiles_per = t1 // split

    def sum_kernel(x_ref, acc_ref):
        @pl.when(pl.program_id(1) == 0)
        def _():
            acc_ref[...] = jnp.zeros_like(acc_ref)
        # Broadcast the tile's scalar sum across the (8,128) accumulator block,
        # so every element of a core-slice's block holds that slice's running sum.
        acc_ref[...] += jnp.sum(x_ref[...], dtype=jnp.float32)

    partials = pl.pallas_call(
        sum_kernel,
        out_shape=jax.ShapeDtypeStruct((split * 8, 128), jnp.float32),
        grid=(split, tiles_per),
        in_specs=[pl.BlockSpec((tr1, cols), lambda c, i: (c * tiles_per + i, 0))],
        out_specs=pl.BlockSpec((8, 128), lambda c, i: (c, 0)),   # resident per core-slice
        compiler_params=pltpu.CompilerParams(
            dimension_semantics=("parallel", "arbitrary"),
            vmem_limit_bytes=vlim),
    )(x2d)

    # ---- phase 2: subtract the global mean; partial sums ride along in SMEM ----
    def sub_kernel(sums_ref, x_ref, o_ref):
        total = sums_ref[0, 0]
        for c in range(1, split):                 # static unroll (split is 1 or 2)
            total = total + sums_ref[c * 8, 0]
        mean = total * jnp.float32(inv_n)         # true global count folded in here
        o_ref[...] = (x_ref[...].astype(jnp.float32) - mean).astype(o_ref.dtype)

    t2 = rows // tr2
    extra = {"input_output_aliases": {1: 0}} if donate else {}
    out2d = pl.pallas_call(
        sub_kernel,
        out_shape=jax.ShapeDtypeStruct((rows, cols), x2d.dtype),
        grid=(t2,),
        in_specs=[
            pl.BlockSpec(memory_space=pltpu.MemorySpace.SMEM),   # partial-sum slab
            pl.BlockSpec((tr2, cols), lambda i: (i, 0)),
        ],
        out_specs=pl.BlockSpec((tr2, cols), lambda i: (i, 0)),
        compiler_params=pltpu.CompilerParams(
            dimension_semantics=("parallel",),    # independent tiles (v7x: 2 TCs)
            vmem_limit_bytes=vlim),
        **extra,
    )(partials, x2d)
    return out2d


# ---------------------------------------------------------------------------
# Wrapper
# ---------------------------------------------------------------------------
def centered_layer(x, donate=False):
    """x - x.mean() (global mean over all elements), Pallas TPU implementation."""
    n = int(x.size)
    itemsize = jnp.dtype(x.dtype).itemsize
    inv_n = 1.0 / n
    phys = _vmem_capacity_bytes()

    # ~21 MiB input on v5e/v6e (128 MiB VMEM), ~10.7 MiB on v7x (64 MiB VMEM);
    # keeps ~4x headroom for the in-kernel value/temporary materialization.
    single_cap = min(phys // 6, 24 << 20)
    wide = max(4, itemsize)          # account for f32 temporaries (bf16 inputs)

    view = _single_block_view(n)

    # ---- 1) grid-less single block (2N HBM traffic, no per-step overhead) ----
    if view is not None:
        rows, cols = view
        prows = -(-rows // 8) * 8    # sublane padding the VMEM layout will add
        if prows * cols * wide <= single_cap:
            return _single_block(x.reshape(rows, cols), inv_n, phys).reshape(x.shape)
    elif n * itemsize <= (256 << 10):
        # tiny, awkward element count (e.g. the (1, 4) demo input): one block
        return _single_block(x.reshape(1, n), inv_n, phys).reshape(x.shape)
    elif n * wide * 2 <= single_cap:
        # small-ish awkward count: zero-pad to a lane-dense slab (zeros don't
        # change the sum; divisor is the true n), then slice the pad off.
        cols = 128
        rows = -(-(-(-n // cols)) // 8) * 8
        padded = jnp.pad(x.reshape(-1), (0, rows * cols - n)).reshape(rows, cols)
        return _single_block(padded, inv_n, phys).reshape(-1)[:n].reshape(x.shape)

    # ---- 2) large inputs: two-phase tiled pipeline ----
    tiled = _tiled_view(n, itemsize)
    if tiled is not None:
        rows, cols, tr1, tr2 = tiled
        out = _two_phase(x.reshape(rows, cols), inv_n, tr1, tr2, phys, donate)
        return out.reshape(x.shape)

    # ---- 3) large + awkward size: zero-pad into a tileable lane-dense slab ----
    cols = 512
    tr2 = max(8, min(_PHASE2_TILE_BYTES // (cols * itemsize), 512) // 8 * 8)
    tr1 = 2 * tr2
    rows = -(-(-(-n // cols)) // tr1) * tr1
    padded = jnp.pad(x.reshape(-1), (0, rows * cols - n)).reshape(rows, cols)
    out = _two_phase(padded, inv_n, tr1, tr2, phys, donate=False)
    return out.reshape(-1)[:n].reshape(x.shape)


if __name__ == "__main__":
    key = jax.random.PRNGKey(0)
    k1, k2, k3, k4 = jax.random.split(key, 4)

    # 1) The exact PyTorch demo input: torch.ones(1, 4) -> all zeros out.
    x1 = jnp.ones((1, 4), dtype=jnp.float32)
    o1 = jax.block_until_ready(centered_layer(x1))
    assert o1.shape == x1.shape and o1.dtype == x1.dtype
    assert jnp.max(jnp.abs(o1 - (x1 - jnp.mean(x1)))) < 1e-6
    assert jnp.abs(jnp.mean(o1)) < 1e-6

    # 2) Small f32 input (lane-dense single-block path).
    x2 = jax.random.normal(k1, (8, 32), dtype=jnp.float32)
    o2 = jax.block_until_ready(centered_layer(x2))
    assert o2.shape == x2.shape and o2.dtype == x2.dtype
    assert jnp.max(jnp.abs(o2 - (x2 - jnp.mean(x2)))) < 1e-5

    # 3) Tiny awkward element count (no multiple-of-128 divisor).
    x3 = jax.random.normal(k2, (3, 5, 7), dtype=jnp.float32)
    o3 = jax.block_until_ready(centered_layer(x3))
    assert o3.shape == x3.shape
    assert jnp.max(jnp.abs(o3 - (x3 - jnp.mean(x3)))) < 1e-5

    # 4) Medium awkward (prime-ish) length -> zero-padded single-block path.
    x4 = jax.random.normal(k3, (100003,), dtype=jnp.float32)
    o4 = jax.block_until_ready(centered_layer(x4))
    assert o4.shape == x4.shape
    assert jnp.max(jnp.abs(o4 - (x4 - jnp.mean(x4)))) < 1e-4

    # 5) bf16 input: reduction in f32, output stays bf16.
    x5 = jax.random.normal(k4, (4, 64), dtype=jnp.bfloat16)
    o5 = jax.block_until_ready(centered_layer(x5))
    assert o5.shape == x5.shape and o5.dtype == x5.dtype
    ref5 = x5.astype(jnp.float32) - jnp.mean(x5.astype(jnp.float32))
    assert jnp.max(jnp.abs(o5.astype(jnp.float32) - ref5)) < 5e-2

    # 6) Large f32 input -> two-phase tiled path (multi-tile reduction with the
    #    split "parallel" axis + parallel subtract phase) on every generation.
    x6 = jax.random.normal(jax.random.PRNGKey(1), (4096, 2048), dtype=jnp.float32)
    o6 = jax.block_until_ready(centered_layer(x6))
    ref6 = x6 - jnp.mean(x6)
    assert o6.shape == x6.shape and o6.dtype == x6.dtype
    assert jnp.max(jnp.abs(o6 - ref6)) < 1e-4
    assert jnp.abs(jnp.mean(o6)) < 1e-4

    # 7) Same large input with HBM-buffer reuse (input_output_aliases) under jit.
    o7 = jax.block_until_ready(jax.jit(lambda a: centered_layer(a, donate=True))(x6))
    assert jnp.max(jnp.abs(o7 - ref6)) < 1e-4

    print("KERNEL_OK")
</pallas_src>

<mosaic_0001>
module attributes {stable_mosaic.version = 11 : i64} {
  func.func @kernel(%arg0: memref<1x4xf32, #tpu.memory_space<vmem>>, %arg1: memref<1x4xf32, #tpu.memory_space<vmem>>) attributes {dimension_semantics = [], scalar_prefetch = 0 : i64, scratch_operands = 0 : i64, tpu.core_type = #tpu.core_type<tc>} {
    %c0 = arith.constant 0 : index
    %c0_0 = arith.constant 0 : index
    %0 = vector.load %arg0[%c0, %c0_0] : memref<1x4xf32, #tpu.memory_space<vmem>>, vector<1x4xf32>
    %1 = vector.shape_cast %0 : vector<1x4xf32> to vector<1x1x4xf32>
    %cst = arith.constant dense<0.000000e+00> : vector<1xf32>
    %2 = vector.multi_reduction <add>, %1, %cst [1, 2] : vector<1x1x4xf32> to vector<1xf32>
    %3 = vector.shape_cast %2 : vector<1xf32> to vector<1x1x1xf32>
    %4 = vector.extract %3[0, 0, 0] : f32 from vector<1x1x1xf32>
    %cst_1 = arith.constant 2.500000e-01 : f32
    %5 = arith.mulf %4, %cst_1 : f32
    %6 = vector.broadcast %5 : f32 to vector<1x4xf32>
    %7 = arith.subf %0, %6 : vector<1x4xf32>
    %c0_2 = arith.constant 0 : index
    %c0_3 = arith.constant 0 : index
    %8 = vector.load %arg1[%c0_2, %c0_3] : memref<1x4xf32, #tpu.memory_space<vmem>>, vector<1x4xf32>
    tpu.vector_store %arg1[%c0_2, %c0_3], %7 {strides = array<i32>} : memref<1x4xf32, #tpu.memory_space<vmem>>, vector<1x4xf32>,
    return
  }
}

</mosaic_0001>

<bundles_post_ra>
// kernel: tpu_custom_call.1
= control target key start
LH: loop header
LB: loop body
LE: loop exit
PB: predicated region body
PF: predicated region fallthrough
CT: control target
= control target key end

     0   :  { %6 = vsyncpa [#allocation3], 0  ;;  %s142_s0 = inlined_call_operand.hbm [shape: f32[1,4], index: 0, kind: input, shape index: {}]   ;;  %s143_s1 = inlined_call_operand.hbm [shape: f32[1,4], index: 1, kind: output, shape index: {}]  }
   0x1   :  { %7 = vsyncpa [#allocation4], 0  ;;  %s104_s6 = smov [#allocation2]   ;;  %s56_s10 = scalar_lea.hbm %s142_s0, 16 }
   0x2   :  { %s14_s7 = sshll.u32 %s104_s6, 4  ;;  %p57_p0 = scmp.ne.s32.totalorder %s142_s0, %s56_s10  ;;  %s15_s7 = int_to_ptr.vmem [resolvable:$true] %s14_s7 }
   0x3   :  { %p60_p1 = scmp.lt.u32.totalorder %s56_s10, %s142_s0 }
   0x5   :  { %p62_p2 = pnand %p60_p1, %p57_p0 }
   0x7   :  { %65 = shalt.err (!%p62_p2)
}
   0x8   :  { %s66_s15 = scalar_lea.vmem %s15_s7, 16  ;;  %s70_s16 = scalar_lea.vmem %s15_s7, 32 }
   0x9   :  { %p67_p3 = scmp.ne.s32.totalorder %s15_s7, %s66_s15  ;;  %p71_p4 = scmp.lt.s32.totalorder %s15_s7, %s15_s7 }
   0xa   :  { %p72_p5 = scmp.lt.s32.totalorder %s70_s16, %s66_s15 }
   0xc   :  { %p73_p6 = por %p72_p5, %p71_p4 }
   0xe   :  { %p74_p7 = pnand %p73_p6, %p67_p3 }
  0x10   :  { %77 = shalt.err (!%p74_p7)
}
  0x11   :  { %17 = dma.hbm_to_vmem [thread:$0]  %s142_s0, 16, %s15_s7, [#allocation3]  }
  0x12   :  { %100 = dma.done.wait [#allocation3], 16  }
  0x13   :  { %101 = vsyncadd [#allocation3], 4294967280  ;;  %vm22_vm0 = vcmask 24576   ;;  %v21_v0 = vld [vmem:[#allocation2] sm:$0x1]  ;;  %s105_s21 = smov [#allocation5]  }
  0x14   :  { %v23_v1 = vsel %vm22_vm0, %v21_v0, 0.0  ;;  %s43_s22 = sshll.u32 %s105_s21, 4  ;;  %s44_s22 = int_to_ptr.vmem [resolvable:$true] %s43_s22 }
  0x15   :  { %24 = vadd.xlane.f32.xlu0 %v23_v1  ;;  %s78_s0 = scalar_lea.vmem %s44_s22, 16  ;;  %s82_s23 = scalar_lea.vmem %s44_s22, 32 }
  0x16   :  { %p79_p8 = scmp.ne.s32.totalorder %s44_s22, %s78_s0  ;;  %p83_p9 = scmp.lt.s32.totalorder %s44_s22, %s44_s22 }
  0x17   :  { %p84_p10 = scmp.lt.s32.totalorder %s82_s23, %s78_s0 }
  0x19   :  { %p85_p11 = por %p84_p10, %p83_p9 }
  0x1b   :  { %p86_p12 = pnand %p85_p11, %p79_p8 }
  0xa2   :  { %v25_v2 = vpop.xlane.xlu0 %24 }
  0xa3   :  { %v26_v3 = vrot.slane %v25_v2, 4 }
  0xa5   :  { %v27_v4 = vadd.f32 %v26_v3, %v25_v2 }
  0xa7   :  { %v28_v5 = vrot.slane %v27_v4, 2 }
  0xa9   :  { %v29_v6 = vadd.f32 %v28_v5, %v27_v4 }
  0xab   :  { %v30_v7 = vrot.slane %v29_v6, 1 }
  0xad   :  { %v31_v8 = vadd.f32 %v30_v7, %v29_v6 }
  0xaf   :  { %52 = vpush %v31_v8 }
  0xe0   :  { %s53_s19 = spop %52 }
  0xe1   :  { %s33_s20 = smul.f32 0.25, %s53_s19 }
  0xe3   :  { %v34_v9 = vstv %s33_s20 }
  0xe4   :  { %v35_v10 = vsub.f32 %v21_v0, %v34_v9 }
  0xe6   :  { %36 = vst.msk [vmem:[#allocation5] sm:$0x1] %vm22_vm0, %v35_v10 }
  0xe7   :  { %89 = shalt.err (!%p86_p12)
}
  0xe8   :  { %s90_s26 = scalar_lea.hbm %s143_s1, 16 }
  0xe9   :  { %p91_p13 = scmp.ne.s32.totalorder %s143_s1, %s90_s26  ;;  %p94_p0 = scmp.lt.u32.totalorder %s90_s26, %s143_s1 }
  0xeb   :  { %p96_p1 = pnand %p94_p0, %p91_p13 }
  0xed   :  { %99 = shalt.err (!%p96_p1)
}
  0xee   :  { %46 = dma.vmem_to_hbm [thread:$0]  %s44_s22, 16, %s143_s1, [#allocation4]  }
  0xef   :  { %102 = dma.done.wait [#allocation4], 16  }
  0xf0   :  { %103 = vsyncadd [#allocation4], 4294967280 }
  0xf1   :  { %50 = vsyncpa [#allocation3], 1 }
  0xf2   :  { %51 = vsyncpa [#allocation4], 1 }

</bundles_post_ra>
